<compile_context>
chip_gen: v7x
topology: tpu7x:2x2x1
jax: 0.10.0
libtpu: 0.0.40
codegen_flags: <defaults>
</compile_context>

<pallas_src>
import functools

import jax
import jax.numpy as jnp
from jax.experimental import pallas as pl
from jax.experimental.pallas import tpu as pltpu


def _round_up(x, m):
    return (x + m - 1) // m * m


# ---------------------------------------------------------------------------
# calc_score kernel:  cf_score = (user_embed + r_embed) @ item_embed.T
#   ur_ref:   (TU, D) bf16   (user + relation, precomputed in wrapper)
#   item_ref: (TI, D) bf16
#   out_ref:  (TU, TI) f32
# ---------------------------------------------------------------------------
def _score_kernel(ur_ref, item_ref, out_ref):
    out_ref[...] = jax.lax.dot_general(
        ur_ref[...], item_ref[...],
        dimension_numbers=(((1,), (1,)), ((), ())),   # contract over embed_dim
        preferred_element_type=jnp.float32,           # f32 MXU accumulation
    )


def ecfkg_calc_score(user_embed, r_embed, item_embed, *, tu=256, ti=1024,
                     compute_dtype=jnp.bfloat16):
    U, D = user_embed.shape
    I, _ = item_embed.shape

    # Hoist the broadcast add out of the kernel (single fused XLA add),
    # cast to bf16: halves HBM traffic, native MXU dtype on v5e/v6e/v7x.
    ur = (user_embed + r_embed).astype(compute_dtype)
    item = item_embed.astype(compute_dtype)

    # Clamp tiles to (padded) problem size; pad to tile multiples.
    tu_eff = min(tu, _round_up(U, 8))
    ti_eff = min(ti, _round_up(I, 128))
    Up, Ip = _round_up(U, tu_eff), _round_up(I, ti_eff)
    if Up != U:
        ur = jnp.pad(ur, ((0, Up - U), (0, 0)))
    if Ip != I:
        item = jnp.pad(item, ((0, Ip - I), (0, 0)))

    out = pl.pallas_call(
        _score_kernel,
        out_shape=jax.ShapeDtypeStruct((Up, Ip), jnp.float32),
        grid_spec=pltpu.PrefetchScalarGridSpec(
            num_scalar_prefetch=0,
            grid=(Up // tu_eff, Ip // ti_eff),
            in_specs=[
                pl.BlockSpec((tu_eff, D), lambda i, j: (i, 0)),
                pl.BlockSpec((ti_eff, D), lambda i, j: (j, 0)),
            ],
            out_specs=pl.BlockSpec((tu_eff, ti_eff), lambda i, j: (i, j)),
        ),
        compiler_params=pltpu.CompilerParams(
            dimension_semantics=("parallel", "parallel")),
    )(ur, item)
    return out[:U, :I]


# ---------------------------------------------------------------------------
# calc_loss kernel:
#   pos_score = sum((h+r)*pos_t, -1); neg_score = sum((h+r)*neg_t, -1)
#   per-row loss = softplus(-pos_score) + softplus(neg_score)   (masked)
#   final mean over the real batch is done in JAX (parallel-friendly grid).
# ---------------------------------------------------------------------------
def _softplus(x):
    # numerically-stable softplus, same semantics as F.softplus
    return jnp.maximum(x, 0.0) + jnp.log1p(jnp.exp(-jnp.abs(x)))


def _loss_kernel(h_ref, r_ref, pos_ref, neg_ref, out_ref, *, tb, batch):
    i = pl.program_id(0)
    hr = h_ref[...].astype(jnp.float32) + r_ref[...].astype(jnp.float32)  # (tb, D)
    pos = pos_ref[...].astype(jnp.float32)
    neg = neg_ref[...].astype(jnp.float32)
    pos_score = jnp.sum(hr * pos, axis=1, keepdims=True)                  # (tb, 1)
    neg_score = jnp.sum(hr * neg, axis=1, keepdims=True)                  # (tb, 1)
    per_row = _softplus(-pos_score) + _softplus(neg_score)                # (tb, 1)
    # zero the rows that come from batch padding
    row_ids = i * tb + jax.lax.broadcasted_iota(jnp.int32, (tb, 1), 0)
    out_ref[...] = jnp.where(row_ids < batch, per_row, 0.0)


def ecfkg_calc_loss(h_embed, r_embed, pos_t_embed, neg_t_embed, *, tb=2048,
                    compute_dtype=jnp.bfloat16):
    B, D = h_embed.shape
    tb_eff = min(tb, _round_up(B, 8))   # tb=2048: ~4 MB double-buffered inputs, fits all gens
    Bp = _round_up(B, tb_eff)

    def prep(x):
        x = x.astype(compute_dtype)
        if Bp != B:
            x = jnp.pad(x, ((0, Bp - B), (0, 0)))
        return x

    h, r, pos, neg = (prep(x) for x in (h_embed, r_embed, pos_t_embed, neg_t_embed))

    kernel = functools.partial(_loss_kernel, tb=tb_eff, batch=B)
    per_row = pl.pallas_call(
        kernel,
        out_shape=jax.ShapeDtypeStruct((Bp, 1), jnp.float32),
        grid_spec=pltpu.PrefetchScalarGridSpec(
            num_scalar_prefetch=0,
            grid=(Bp // tb_eff,),
            in_specs=[pl.BlockSpec((tb_eff, D), lambda i: (i, 0))] * 4,
            out_specs=pl.BlockSpec((tb_eff, 1), lambda i: (i, 0)),
        ),
        compiler_params=pltpu.CompilerParams(
            dimension_semantics=("parallel",)),   # distinct output blocks per step
    )(h, r, pos, neg)
    return jnp.sum(per_row) / B


# ---------------------------------------------------------------------------
# ECFKG module (JAX side): parameter init + embedding gathers (glue) + kernels
# ---------------------------------------------------------------------------
def _xavier_normal(key, shape, dtype=jnp.float32):
    # PyTorch xavier_normal_ on a (rows, cols) tensor: fan_in=cols, fan_out=rows
    fan_out, fan_in = shape
    std = (2.0 / (fan_in + fan_out)) ** 0.5
    return std * jax.random.normal(key, shape, dtype)


class ECFKGPallas:
    def __init__(self, n_users, n_entities, n_relations, embed_dim, key):
        self.n_users = n_users
        self.n_entities = n_entities
        self.n_relations = n_relations
        self.embed_dim = embed_dim
        k1, k2 = jax.random.split(key)
        # use_pretrain == 0 branch: plain xavier_normal init (deterministic).
        self.relation_embed = _xavier_normal(k1, (n_relations, embed_dim))
        self.entity_user_embed = _xavier_normal(k2, (n_entities + n_users, embed_dim))
        # TODO(synk): random_embedding (Laplace noise) and random_rec (random
        # shuffling of item rows) are RNG-driven eval perturbations with no
        # deterministic Pallas equivalent; they default to 0 and are omitted.

    def calc_score(self, user_ids, item_ids, relation_id):
        r_embed = jnp.take(self.relation_embed, relation_id, axis=0)       # (1, D)
        user_embed = jnp.take(self.entity_user_embed, user_ids, axis=0)    # (U, D)
        item_embed = jnp.take(self.entity_user_embed, item_ids, axis=0)    # (I, D)
        return ecfkg_calc_score(user_embed, r_embed, item_embed)

    def calc_loss(self, h, r, pos_t, neg_t):
        r_embed = jnp.take(self.relation_embed, r, axis=0)                 # (B, D)
        h_embed = jnp.take(self.entity_user_embed, h, axis=0)              # (B, D)
        pos_t_embed = jnp.take(self.entity_user_embed, pos_t, axis=0)      # (B, D)
        neg_t_embed = jnp.take(self.entity_user_embed, neg_t, axis=0)      # (B, D)
        return ecfkg_calc_loss(h_embed, r_embed, pos_t_embed, neg_t_embed)

    def forward(self, *inputs, is_train):
        if is_train:
            return self.calc_loss(*inputs)
        return self.calc_score(*inputs)


# ---------------------------------------------------------------------------
# main
# ---------------------------------------------------------------------------
if __name__ == "__main__":
    key = jax.random.PRNGKey(0)
    k_model, k_h, k_r, k_pos, k_neg, k_users = jax.random.split(key, 6)

    n_users, n_entities, n_relations, embed_dim = 64, 256, 4, 128
    model = ECFKGPallas(n_users, n_entities, n_relations, embed_dim, k_model)

    bf = lambda x: x.astype(jnp.bfloat16).astype(jnp.float32)

    # ----- eval path (calc_score) -----
    user_ids = n_entities + jax.random.randint(k_users, (8,), 0, n_users)   # user rows
    item_ids = jnp.arange(256, dtype=jnp.int32)                             # item/entity rows
    relation_id = jnp.array([1], dtype=jnp.int32)
    cf_score = model.forward(user_ids, item_ids, relation_id, is_train=False)
    cf_score = jax.block_until_ready(cf_score)

    # reference check (same bf16 quantization as the kernel, f32 accumulation)
    r_e = model.relation_embed[relation_id]
    u_e = model.entity_user_embed[user_ids]
    i_e = model.entity_user_embed[item_ids]
    ref_score = bf(u_e + r_e) @ bf(i_e).T
    assert cf_score.shape == (8, 256)
    assert jnp.allclose(cf_score, ref_score, atol=1e-3, rtol=1e-3)

    # ----- train path (calc_loss) -----
    batch = 16
    h = jax.random.randint(k_h, (batch,), 0, n_entities + n_users)
    r = jax.random.randint(k_r, (batch,), 0, n_relations)
    pos_t = jax.random.randint(k_pos, (batch,), 0, n_entities + n_users)
    neg_t = jax.random.randint(k_neg, (batch,), 0, n_entities + n_users)
    kg_loss = model.forward(h, r, pos_t, neg_t, is_train=True)
    kg_loss = jax.block_until_ready(kg_loss)

    # reference check (same bf16 quantization as the kernel)
    hr = bf(model.entity_user_embed[h]) + bf(model.relation_embed[r])
    pos_s = jnp.sum(hr * bf(model.entity_user_embed[pos_t]), axis=1)
    neg_s = jnp.sum(hr * bf(model.entity_user_embed[neg_t]), axis=1)
    ref_loss = jnp.mean(jax.nn.softplus(-pos_s) + jax.nn.softplus(neg_s))
    assert kg_loss.shape == ()
    assert jnp.allclose(kg_loss, ref_loss, atol=1e-4, rtol=1e-4)

    print("KERNEL_OK")
</pallas_src>

<mosaic_0001>
module attributes {stable_mosaic.version = 11 : i64} {
  func.func @_score_kernel(%arg0: i32, %arg1: i32, %arg2: memref<8x128xbf16, #tpu.memory_space<vmem>>, %arg3: memref<256x128xbf16, #tpu.memory_space<vmem>>, %arg4: memref<8x256xf32, #tpu.memory_space<vmem>>) attributes {dimension_semantics = [#tpu.dimension_semantics<parallel>, #tpu.dimension_semantics<parallel>], iteration_bounds = array<i64: 1, 1>, scalar_prefetch = 0 : i64, scratch_operands = 0 : i64, tpu.core_type = #tpu.core_type<tc>, window_params = [{transform_indices = @transform_0, window_bounds = array<i64: 8, 128>}, {transform_indices = @transform_1, window_bounds = array<i64: 256, 128>}, {transform_indices = @transform_2, window_bounds = array<i64: 8, 256>}]} {
    %c0 = arith.constant 0 : index
    %c0_0 = arith.constant 0 : index
    %0 = vector.load %arg2[%c0, %c0_0] : memref<8x128xbf16, #tpu.memory_space<vmem>>, vector<8x128xbf16>
    %c0_1 = arith.constant 0 : index
    %c0_2 = arith.constant 0 : index
    %1 = vector.load %arg3[%c0_1, %c0_2] : memref<256x128xbf16, #tpu.memory_space<vmem>>, vector<256x128xbf16>
    %cst = arith.constant dense<0.000000e+00> : vector<8x256xf32>
    %2 = tpu.matmul %0, %1, %cst {dimension_numbers = #tpu.dot_dimension_numbers<[1], [1], [0], [0], [0, 0, 1, 0], [], []>} : vector<8x128xbf16>, vector<256x128xbf16>, vector<8x256xf32> -> vector<8x256xf32>
    %c0_3 = arith.constant 0 : index
    %c0_4 = arith.constant 0 : index
    %3 = vector.load %arg4[%c0_3, %c0_4] : memref<8x256xf32, #tpu.memory_space<vmem>>, vector<8x256xf32>
    tpu.vector_store %arg4[%c0_3, %c0_4], %2 {strides = array<i32>} : memref<8x256xf32, #tpu.memory_space<vmem>>, vector<8x256xf32>,
    return
  }
  func.func @transform_0(%arg0: i32, %arg1: i32) -> (i32, i32) {
    %c0_i32 = arith.constant 0 : i32
    %c0_i32_0 = arith.constant 0 : i32
    return %arg0, %c0_i32 : i32, i32
  }
  func.func @transform_1(%arg0: i32, %arg1: i32) -> (i32, i32) {
    %c0_i32 = arith.constant 0 : i32
    %c0_i32_0 = arith.constant 0 : i32
    return %arg1, %c0_i32 : i32, i32
  }
  func.func @transform_2(%arg0: i32, %arg1: i32) -> (i32, i32) {
    %c0_i32 = arith.constant 0 : i32
    return %arg0, %arg1 : i32, i32
  }
}

</mosaic_0001>

<bundles_post_ra>
// kernel: tpu_custom_call.1
= control target key start
LH: loop header
LB: loop body
LE: loop exit
PB: predicated region body
PF: predicated region fallthrough
CT: control target
= control target key end

     0   :  { %7 = vsyncpa [#allocation3], 0  ;;  %s417_s0 = inlined_call_operand.hbm [shape: bf16[8,128], index: 0, kind: input, shape index: {}]   ;;  %s418_s1 = inlined_call_operand.hbm [shape: bf16[256,128], index: 1, kind: input, shape index: {}]   ;;  %s419_s2 = inlined_call_operand.hbm [shape: f32[8,256], index: 2, kind: output, shape index: {}]  }
   0x1   :  { %8 = vsyncpa [#allocation6], 0 }
   0x2   :  { %9 = vsyncpa [#allocation4], 0  ;;  %s354_s9 = smov [#allocation2]   ;;  %s355_s11 = smov [#allocation5]  }
   0x3   :  { %s16_s10 = sshll.u32 %s354_s9, 4  ;;  %s25_s12 = sshll.u32 %s355_s11, 4  ;;  %s17_s10 = int_to_ptr.vmem [resolvable:$true] %s16_s10  ;;  %s374_s12 = int_to_ptr.vmem [resolvable:$true] %s25_s12 }
   0x4   :  { %s282_s15 = scalar_lea.hbm %s417_s0, 64 }
   0x5   :  { %p283_p0 = scmp.ne.s32.totalorder %s417_s0, %s282_s15  ;;  %p286_p1 = scmp.lt.u32.totalorder %s282_s15, %s417_s0 }
   0x7   :  { %p288_p2 = pnand %p286_p1, %p283_p0 }
   0x9   :  { %291 = shalt.err (!%p288_p2)
}
   0xa   :  { %s292_s20 = scalar_lea.vmem %s17_s10, 64  ;;  %p297_p4 = scmp.lt.s32.totalorder %s17_s10, %s17_s10 }
   0xb   :  { %p293_p3 = scmp.ne.s32.totalorder %s17_s10, %s292_s20  ;;  %p298_p5 = scmp.lt.s32.totalorder %s292_s20, %s292_s20 }
   0xd   :  { %p299_p6 = por %p298_p5, %p297_p4 }
   0xf   :  { %p300_p7 = pnand %p299_p6, %p293_p3 }
  0x11   :  { %303 = shalt.err (!%p300_p7)
}
  0x12   :  { %19 = dma.hbm_to_vmem [thread:$0]  %s417_s0, 64, %s17_s10, [#allocation3]  }
  0x13   :  { %s304_s25 = scalar_lea.hbm %s418_s1, 2048 }
  0x14   :  { %p305_p8 = scmp.ne.s32.totalorder %s418_s1, %s304_s25  ;;  %p308_p9 = scmp.lt.u32.totalorder %s304_s25, %s418_s1 }
  0x16   :  { %p310_p10 = pnand %p308_p9, %p305_p8 }
  0x18   :  { %313 = shalt.err (!%p310_p10)
}
  0x19   :  { %s314_s30 = scalar_lea.vmem %s374_s12, 2048  ;;  %p319_p12 = scmp.lt.s32.totalorder %s374_s12, %s374_s12 }
  0x1a   :  { %p315_p11 = scmp.ne.s32.totalorder %s374_s12, %s314_s30  ;;  %p320_p13 = scmp.lt.s32.totalorder %s314_s30, %s314_s30 }
  0x1c   :  { %p321_p0 = por %p320_p13, %p319_p12 }
  0x1e   :  { %p322_p1 = pnand %p321_p0, %p315_p11 }
  0x20   :  { %325 = shalt.err (!%p322_p1)
}
  0x21   :  { %s356_s0 = smov 64   ;;  %s357_s3 = smov 4  }
  0x22   :  { %31 = dma.hbm_to_vmem [thread:$0]  %s418_s1, 2048, %s374_s12, [#allocation6], %s356_s0, %s356_s0, %s357_s3  }
  0x23   :  { %348 = dma.done.wait [#allocation3], 64  }
  0x24   :  { %349 = vsyncadd [#allocation3], 4294967232 }
  0x25   :  { %350 = dma.done.wait [#allocation6], 2048  }
  0x26   :  { %351 = vsyncadd [#allocation6], 4294965248  ;;  %v266_v0 = vld [vmem:[#allocation5 + $0x40] sm:$0xff]   ;;  %v268_v2 = vld [vmem:[#allocation5 + $0x48] sm:$0xff]   ;;  %s358_s1 = smov [#allocation7]  }
  0x27   :  { %v267_v1 = vld [vmem:[#allocation5] sm:$0xff]   ;;  %243 = vmatprep.subr.bf16.mxu0 %v266_v0  ;;  %v269_v3 = vld [vmem:[#allocation5 + $0x8] sm:$0xff]   ;;  %v270_v4 = vld [vmem:[#allocation5 + $0x50] sm:$0xff]   ;;  %s217_s6 = sshll.u32 %s358_s1, 4  ;;  %s218_s6 = int_to_ptr.vmem [resolvable:$true] %s217_s6 }
  0x28   :  { %244 = vmatpush3.bf16.xpose.msra.mxu0 %v267_v1  ;;  %v271_v5 = vld [vmem:[#allocation5 + $0x10] sm:$0xff]   ;;  %v272_v6 = vld [vmem:[#allocation5 + $0x58] sm:$0xff]   ;;  %v274_v9 = vld [vmem:[#allocation5 + $0x60] sm:$0xff]   ;;  %s326_s7 = scalar_lea.vmem %s218_s6, 256  ;;  %p331_p3 = scmp.lt.s32.totalorder %s218_s6, %s218_s6 }
  0x29   :  { %245 = vmatprep.subr.bf16.mxu0 %v268_v2  ;;  %v39_v7 = vld [vmem:[#allocation2] sm:$0xf]  ;;  %v275_v10 = vld [vmem:[#allocation5 + $0x20] sm:$0xff]   ;;  %v276_v11 = vld [vmem:[#allocation5 + $0x68] sm:$0xff]   ;;  %p327_p2 = scmp.ne.s32.totalorder %s218_s6, %s326_s7  ;;  %p332_p4 = scmp.lt.s32.totalorder %s326_s7, %s326_s7 }
  0x2a   :  { %259 = vmatprep.mubr.bf16.mxu0 %v39_v7  ;;  %v273_v8 = vld [vmem:[#allocation5 + $0x18] sm:$0xff]   ;;  %v277_v12 = vld [vmem:[#allocation5 + $0x28] sm:$0xff]   ;;  %v278_v13 = vld [vmem:[#allocation5 + $0x70] sm:$0xff]  }
  0x2b   :  { %v279_v14 = vld [vmem:[#allocation5 + $0x30] sm:$0xff]   ;;  %v280_v15 = vld [vmem:[#allocation5 + $0x78] sm:$0xff]   ;;  %p333_p5 = por %p332_p4, %p331_p3 }
  0x2c   :  { %v281_v16 = vld [vmem:[#allocation5 + $0x38] sm:$0xff]  }
  0x2d   :  { %p334_p6 = pnand %p333_p5, %p327_p2 }
  0x30   :  { %246 = vmatpush3.bf16.xpose.msra.mxu0 %v269_v3 }
  0x31   :  { %247 = vmatprep.subr.bf16.mxu0 %v270_v4 }
  0x38   :  { %248 = vmatpush3.bf16.xpose.msra.mxu0 %v271_v5 }
  0x39   :  { %249 = vmatprep.subr.bf16.mxu0 %v272_v6 }
  0x40   :  { %250 = vmatpush3.bf16.xpose.msra.mxu0 %v273_v8 }
  0x41   :  { %251 = vmatprep.subr.bf16.mxu0 %v274_v9 }
  0x48   :  { %252 = vmatpush3.bf16.xpose.msra.mxu0 %v275_v10 }
  0x49   :  { %253 = vmatprep.subr.bf16.mxu0 %v276_v11 }
  0x50   :  { %254 = vmatpush3.bf16.xpose.msra.mxu0 %v277_v12 }
  0x51   :  { %255 = vmatprep.subr.bf16.mxu0 %v278_v13 }
  0x58   :  { %256 = vmatpush3.bf16.xpose.msra.mxu0 %v279_v14 }
  0x59   :  { %257 = vmatprep.subr.bf16.mxu0 %v280_v15 }
  0x60   :  { %258 = vmatpush3.bf16.xpose.msra.mxu0 %v281_v16 }
  0x67   :  { %260 = vmatmul.mubr.bf16.vlgmr.msra.gmra.mrb[0].mxu0 %v39_v7 }
 0x13a   :  { %v202_v17 = vpop.f32.mrb[0].mxu0 }
 0x13b   :  { %209 = vst [vmem:[#allocation7] sm:$0xff] %v202_v17  ;;  %v204_v18 = vpop.f32.mrb[1].mxu0 }
 0x13c   :  { %210 = vst [vmem:[#allocation7 + $0x8] sm:$0xff] %v204_v18  ;;  %v206_v19 = vpop.f32.mrb[2].mxu0 }
 0x13d   :  { %v207_v20 = vpop.f32.mrb[3].mxu0 }
 0x13e   :  { %337 = shalt.err (!%p334_p6)
}
 0x13f   :  { %s338_s10 = scalar_lea.hbm %s419_s2, 256 }
 0x140   :  { %p339_p7 = scmp.ne.s32.totalorder %s419_s2, %s338_s10  ;;  %p342_p8 = scmp.lt.u32.totalorder %s338_s10, %s419_s2 }
 0x142   :  { %p344_p9 = pnand %p342_p8, %p339_p7 }
 0x144   :  { %347 = shalt.err (!%p344_p9)
}
 0x145   :  { %220 = dma.vmem_to_hbm [thread:$0]  %s218_s6, 256, %s419_s2, [#allocation4]  }
 0x146   :  { %352 = dma.done.wait [#allocation4], 256  }
 0x147   :  { %353 = vsyncadd [#allocation4], 4294967040 }
 0x148   :  { %224 = vsyncpa [#allocation3], 1 }
 0x149   :  { %225 = vsyncpa [#allocation6], 1 }
 0x14a   :  { %226 = vsyncpa [#allocation4], 1 }

</bundles_post_ra>
